<compile_context>
chip_gen: v5e
topology: v5e:2x2
jax: 0.10.0
libtpu: 0.0.40
codegen_flags: <defaults>
</compile_context>

<pallas_src>
import math

import jax
import jax.numpy as jnp
import numpy as np
from jax import lax
from jax.experimental import pallas as pl
from jax.experimental.pallas import tpu as pltpu


# ---------------------------------------------------------------------------
# Generation-aware VMEM budget: physical capacity minus ~16 MiB headroom,
# clamped to [32 MiB, 112 MiB].  v5e/v6e (128 MiB) -> 112 MiB, v7x (64) -> 48.
# ---------------------------------------------------------------------------
def _vmem_limit_bytes():
    cap = None
    try:
        info = pltpu.get_tpu_info()
        cap = int(getattr(info, "vmem_capacity_bytes", 0))
    except Exception:
        cap = None
    if not cap:
        cap = 64 * 1024 * 1024  # conservative fallback
    return int(max(32 * 1024 * 1024,
                   min(cap - 16 * 1024 * 1024, 112 * 1024 * 1024)))


def _round_up(x, m):
    return ((x + m - 1) // m) * m


def _choose_lane_tile(n, max_tile):
    """Lane-aligned tile for an axis of length n.

    If n fits in one tile, use the full (unpadded) extent (a block dim equal to
    the full array dim is always legal).  Otherwise pad n to a multiple of 128
    and pick the largest 128-multiple divisor of the padded extent <= max_tile,
    so no extra padding beyond the 128-rounding is wasted.
    Returns (tile, padded_n)."""
    if n <= max_tile:
        return n, n
    n_pad = _round_up(n, 128)
    k = n_pad // 128
    best = 128
    for d in range(1, k + 1):
        if k % d == 0 and d * 128 <= max_tile:
            best = d * 128
    return best, n_pad


def _spectral_tiling(cin, cout, n_modes, vmem_limit, group=8):
    """Pick (m_tile, m_pad, cout_tile) so the bf16 weight tile fits a VMEM
    budget: double-buffered (2, ct, cin, m_tile) bf16 = 8*ct*cin*m_tile bytes."""
    m_tile_max = 2048 if vmem_limit >= (96 << 20) else 1024
    m_tile, m_pad = _choose_lane_tile(n_modes, m_tile_max)
    w_budget = vmem_limit // 3
    max_ct = max(1, w_budget // (8 * cin * m_tile))
    if cout <= max_ct:
        ct = cout
    else:
        # (8,128) rule: the output block sublane dim must be a multiple of 8
        # (or the full Cout); search divisors of Cout that are multiples of 8.
        ct = None
        d = 1
        while d <= max_ct:
            if cout % d == 0 and d % group == 0:
                ct = d
            d += 1
        if ct is None:
            ct = cout  # rare shapes: fall back to full Cout
    return m_tile, m_pad, ct


# ---------------------------------------------------------------------------
# Exact (erf-based) GELU via the Abramowitz & Stegun 7.1.26 erf polynomial.
# Inside the kernel the divide uses the EUP approximate reciprocal refined
# with one Newton step (keeps the VALU slot free); the references use an exact
# divide.  |abs err| of the polynomial ~1.5e-7 (fp32 noise level).
# ---------------------------------------------------------------------------
_SQRT_HALF = 0.7071067811865476


def _erf_gelu(x, use_approx_recip=False):
    z = x * _SQRT_HALF
    s = jnp.where(z < 0.0, -1.0, 1.0)
    az = jnp.abs(z)
    d = 1.0 + 0.3275911 * az
    if use_approx_recip:
        r = pl.reciprocal(d, approx=True)
        t = r * (2.0 - d * r)  # one Newton refinement
    else:
        t = 1.0 / d
    poly = ((((1.061405429 * t - 1.453152027) * t + 1.421413741) * t
             - 0.284496736) * t + 0.254829592) * t
    erf = s * (1.0 - poly * jnp.exp(-az * az))
    return 0.5 * x * (1.0 + erf)


# ---------------------------------------------------------------------------
# Kernel A: per-mode complex channel mixing ("diagonal" spectral contraction)
#   out[b, o, m] = sum_i x[b, i, m] * w[o, i, m]    (complex multiply)
# x packed (2, Cin, MT) f32, w packed (2, ct, Cin, MT) bf16,
# out packed (2, ct, MT) f32.  Output channels are processed in groups with
# full-sublane slab stores; large ct uses fori_loop over groups.
# ---------------------------------------------------------------------------
def _make_spectral_kernel(ct, group):
    assert ct % group == 0
    n_groups = ct // group

    def kernel(x_ref, w_ref, o_ref):
        xr = x_ref[0]  # (Cin, MT) f32
        xi = x_ref[1]

        def emit_group(base):
            rows_r, rows_i = [], []
            for j in range(group):
                wr_o = w_ref[0, base + j].astype(jnp.float32)  # bf16 -> f32
                wi_o = w_ref[1, base + j].astype(jnp.float32)
                pr = xr * wr_o - xi * wi_o
                pi = xr * wi_o + xi * wr_o
                rows_r.append(jnp.sum(pr, axis=0, keepdims=True))
                rows_i.append(jnp.sum(pi, axis=0, keepdims=True))
            o_ref[0, pl.ds(base, group), :] = jnp.concatenate(rows_r, axis=0)
            o_ref[1, pl.ds(base, group), :] = jnp.concatenate(rows_i, axis=0)

        if n_groups <= 8:
            for g in range(n_groups):          # static unroll, static offsets
                emit_group(g * group)
        else:
            def body(g, carry):                # bounds vreg live ranges
                emit_group(pl.multiple_of(g * group, group))
                return carry
            lax.fori_loop(0, n_groups, body, 0, unroll=False)

    return kernel


def spectral_contract(x_packed, w_packed, cfg):
    """x_packed: (2, B, Cin, M) f32.  w_packed: (2, Cout, Cin, m_pad) bf16."""
    _, B, Cin, M = x_packed.shape
    Cout = w_packed.shape[1]
    m_tile, m_pad, ct = cfg["m_tile"], cfg["m_pad"], cfg["cout_tile"]
    vmem_limit = cfg["vmem_limit"]
    assert w_packed.shape[-1] == m_pad and Cout % ct == 0

    if m_pad != M:
        x_packed = jnp.pad(x_packed, ((0, 0), (0, 0), (0, 0), (0, m_pad - M)))

    group = 8 if ct % 8 == 0 else ct
    # Batch innermost -> the weight tile's index map is invariant over it, so
    # the (potentially large) weight tile is reused across the batch.
    grid = (Cout // ct, m_pad // m_tile, B)

    out = pl.pallas_call(
        _make_spectral_kernel(ct, group),
        out_shape=jax.ShapeDtypeStruct((2, B, Cout, m_pad), jnp.float32),
        grid=grid,
        in_specs=[
            pl.BlockSpec((2, None, Cin, m_tile), lambda c, m, b: (0, b, 0, m)),
            pl.BlockSpec((2, ct, Cin, m_tile), lambda c, m, b: (0, c, 0, m)),
        ],
        out_specs=pl.BlockSpec((2, None, ct, m_tile),
                               lambda c, m, b: (0, b, c, m)),
        compiler_params=pltpu.CompilerParams(
            dimension_semantics=("parallel", "parallel", "parallel"),
            vmem_limit_bytes=vmem_limit,
        ),
    )(x_packed, w_packed)
    return out[:, :, :, :M]


# ---------------------------------------------------------------------------
# Kernel B: fused pointwise path, channels-on-sublane / pixels-on-lane:
#   GELU -> fc1 (1x1 conv, bf16 MXU) -> GELU -> fc2 (1x1 conv, bf16 MXU)
#   -> + residual.   x tile (Cout, TP); w1 (hidden, Cout) bf16; w2 (Cin, hidden) bf16.
# Note: MXU efficiency needs the contraction dims (Cout / hidden) >= ~128; at
# small channel counts the kernel is GELU/VPU bound (expected for the demo).
# ---------------------------------------------------------------------------
def _pointwise_kernel(xs_ref, res_ref, w1_ref, b1_ref, w2_ref, b2_ref, out_ref):
    x = _erf_gelu(xs_ref[...], use_approx_recip=True)                 # act_layer0
    h = jnp.dot(w1_ref[...], x.astype(jnp.bfloat16),
                preferred_element_type=jnp.float32) + b1_ref[...]     # fc1
    h = _erf_gelu(h, use_approx_recip=True)                           # MLP act
    y = jnp.dot(w2_ref[...], h.astype(jnp.bfloat16),
                preferred_element_type=jnp.float32) + b2_ref[...]     # fc2
    out_ref[...] = y + res_ref[...]                                   # identity skip


def pointwise_path(xs, res, w1_bf16, b1, w2_bf16, b2, vmem_limit):
    B, Cout, P = xs.shape
    Cin = res.shape[1]
    hidden = w1_bf16.shape[0]

    # Pixel tile: lane-dense, sized so the double-buffered (xs + res + out)
    # tiles use about half the VMEM budget, capped at 4096.
    per_pix_bytes = (Cout + 2 * Cin) * 4 * 2
    tp_max = max(512, min(4096, (vmem_limit // 2) // max(per_pix_bytes, 1)))
    tp_max = max(128, (tp_max // 128) * 128)
    tp, p_pad = _choose_lane_tile(P, tp_max)
    if p_pad != P:
        xs = jnp.pad(xs, ((0, 0), (0, 0), (0, p_pad - P)))
        res = jnp.pad(res, ((0, 0), (0, 0), (0, p_pad - P)))

    grid = (B, p_pad // tp)
    out = pl.pallas_call(
        _pointwise_kernel,
        out_shape=jax.ShapeDtypeStruct((B, Cin, p_pad), jnp.float32),
        grid=grid,
        in_specs=[
            pl.BlockSpec((None, Cout, tp), lambda b, p: (b, 0, p)),
            pl.BlockSpec((None, Cin, tp), lambda b, p: (b, 0, p)),
            pl.BlockSpec((hidden, Cout), lambda b, p: (0, 0)),
            pl.BlockSpec((hidden, 1), lambda b, p: (0, 0)),
            pl.BlockSpec((Cin, hidden), lambda b, p: (0, 0)),
            pl.BlockSpec((Cin, 1), lambda b, p: (0, 0)),
        ],
        out_specs=pl.BlockSpec((None, Cin, tp), lambda b, p: (b, 0, p)),
        compiler_params=pltpu.CompilerParams(
            dimension_semantics=("parallel", "parallel"),
            vmem_limit_bytes=vmem_limit,
        ),
    )(xs, res, w1_bf16, b1, w2_bf16, b2)
    return out[:, :, :P]


# ---------------------------------------------------------------------------
# Full SFBlock forward (defaults: inner_skip='none', outer_skip='identity',
# norm=Identity, drop=0).
# ---------------------------------------------------------------------------
def sfblock_forward(x, params):
    x = x.astype(jnp.float32)
    B, Cin, H, W = x.shape
    Wf = W // 2 + 1
    Cout = params["w_spec"].shape[0]
    cfg = params["spec_cfg"]

    # --- SpectralConvS2 ------------------------------------------------------
    residual = x                                            # scale_residual=False
    x_hat = jnp.fft.rfft2(x, axes=(-2, -1), norm="ortho")   # (B, Cin, H, Wf)
    x_packed = jnp.stack([jnp.real(x_hat), jnp.imag(x_hat)],
                         axis=0).reshape(2, B, Cin, H * Wf)
    out_packed = spectral_contract(x_packed, params["w_spec_packed"], cfg)
    out_hat = (out_packed[0] + 1j * out_packed[1]).reshape(B, Cout, H, Wf)
    x_spec = jnp.fft.irfft2(out_hat, s=(H, W), axes=(-2, -1), norm="ortho")

    # --- GELU -> MLP -> + identity skip, fused (channels-on-sublane layout) --
    xs = x_spec.reshape(B, Cout, H * W)                     # NCHW flatten, no transpose
    res = residual.reshape(B, Cin, H * W)
    out = pointwise_path(xs, res, params["w1_bf16"], params["b1"],
                         params["w2_bf16"], params["b2"], cfg["vmem_limit"])
    return out.reshape(B, Cin, H, W)


# ---------------------------------------------------------------------------
# Pure-JAX references.
# ---------------------------------------------------------------------------
def sfblock_reference_exact(x, params):
    """Full-f32 mirror of the torch module math (no bf16 anywhere)."""
    x = x.astype(jnp.float32)
    x_hat = jnp.fft.rfft2(x, axes=(-2, -1), norm="ortho")
    w_c = params["w_spec"][..., 0] + 1j * params["w_spec"][..., 1]
    out_hat = jnp.einsum("bilm,oilm->bolm", x_hat, w_c)
    xs = jnp.fft.irfft2(out_hat, s=x.shape[-2:], axes=(-2, -1), norm="ortho")
    xs = jax.nn.gelu(xs, approximate=False)
    h = jnp.einsum("oc,bchw->bohw", params["w1"], xs) \
        + params["b1"][:, 0][None, :, None, None]
    h = jax.nn.gelu(h, approximate=False)
    y = jnp.einsum("oc,bchw->bohw", params["w2"], h) \
        + params["b2"][:, 0][None, :, None, None]
    return y + x


def sfblock_reference_matched(x, params):
    """Mirrors the kernel numerics (bf16 weights, bf16 MXU operands with f32
    accumulation, A&S-erf GELU) so it can be compared at tight tolerance."""
    x = x.astype(jnp.float32)
    B, Cin, H, W = x.shape
    Wf = W // 2 + 1
    M = H * Wf
    Cout = params["w_spec"].shape[0]
    x_hat = jnp.fft.rfft2(x, axes=(-2, -1), norm="ortho")
    wp = params["w_spec_packed"][..., :M].astype(jnp.float32)
    w_c = (wp[0] + 1j * wp[1]).reshape(Cout, Cin, H, Wf)
    out_hat = jnp.einsum("bilm,oilm->bolm", x_hat, w_c)
    xs = jnp.fft.irfft2(out_hat, s=(H, W), axes=(-2, -1), norm="ortho")
    xs = _erf_gelu(xs)
    h = jnp.einsum("oc,bchw->bohw", params["w1_bf16"], xs.astype(jnp.bfloat16),
                   preferred_element_type=jnp.float32) \
        + params["b1"][:, 0][None, :, None, None]
    h = _erf_gelu(h)
    y = jnp.einsum("oc,bchw->bohw", params["w2_bf16"], h.astype(jnp.bfloat16),
                   preferred_element_type=jnp.float32) \
        + params["b2"][:, 0][None, :, None, None]
    return y + x


# ---------------------------------------------------------------------------
def init_params(key, in_dim, out_dim, H, W, mlp_ratio=2.0):
    Wf = W // 2 + 1
    hidden = int(out_dim * mlp_ratio)
    k1, k2, k3, k4, k5 = jax.random.split(key, 5)
    # SpectralConvS2: gain = 2.0 (GELU act, inner_skip='none'); std=sqrt(gain/in)
    w_spec = math.sqrt(2.0 / in_dim) * jax.random.normal(
        k1, (out_dim, in_dim, H, Wf, 2), jnp.float32)
    # MLP 1x1-conv weights stored (out_ch, in_ch) for channels-on-sublane matmuls.
    w1 = math.sqrt(2.0 / out_dim) * jax.random.normal(k2, (hidden, out_dim), jnp.float32)
    b1 = 0.02 * jax.random.normal(k3, (hidden, 1), jnp.float32)
    w2 = math.sqrt(1.0 / hidden) * jax.random.normal(k4, (in_dim, hidden), jnp.float32)
    b2 = 0.02 * jax.random.normal(k5, (in_dim, 1), jnp.float32)
    return {"w_spec": w_spec, "w1": w1, "b1": b1, "w2": w2, "b2": b2}


def prepare_params(params, vmem_limit):
    """One-time prep (outside the forward hot path): pack re/im, pad the mode
    axis for the chosen tiling, and cast streamed weights to bf16."""
    Cout, Cin, Hh, Wf, _ = params["w_spec"].shape
    M = Hh * Wf
    m_tile, m_pad, ct = _spectral_tiling(Cin, Cout, M, vmem_limit)
    wr = params["w_spec"][..., 0].reshape(Cout, Cin, M)
    wi = params["w_spec"][..., 1].reshape(Cout, Cin, M)
    w_packed = jnp.stack([wr, wi], axis=0)                    # (2, Cout, Cin, M)
    if m_pad != M:
        w_packed = jnp.pad(w_packed, ((0, 0), (0, 0), (0, 0), (0, m_pad - M)))
    prepared = dict(params)
    prepared["w_spec_packed"] = w_packed.astype(jnp.bfloat16)
    prepared["w1_bf16"] = params["w1"].astype(jnp.bfloat16)
    prepared["w2_bf16"] = params["w2"].astype(jnp.bfloat16)
    prepared["spec_cfg"] = {"m_tile": m_tile, "m_pad": m_pad,
                            "cout_tile": ct, "vmem_limit": vmem_limit}
    return prepared


if __name__ == "__main__":
    B, C, H, W = 2, 4, 16, 16          # input_dim == output_dim (identity outer skip)
    key = jax.random.PRNGKey(0)
    kx, kp = jax.random.split(key)
    x = jax.random.normal(kx, (B, C, H, W), jnp.float32)

    vmem_limit = _vmem_limit_bytes()
    params = init_params(kp, in_dim=C, out_dim=C, H=H, W=W)
    params = prepare_params(params, vmem_limit)

    out = jax.block_until_ready(sfblock_forward(x, params))
    assert out.shape == (B, C, H, W)

    # Tight check against a reference with identical numerics (bf16 weights /
    # MXU operands); loose check against the full-f32 module math (bf16-level
    # tolerance, documented per the perf review).
    ref_matched = jax.block_until_ready(sfblock_reference_matched(x, params))
    np.testing.assert_allclose(np.asarray(out), np.asarray(ref_matched),
                               rtol=5e-3, atol=5e-3)
    ref_exact = jax.block_until_ready(sfblock_reference_exact(x, params))
    np.testing.assert_allclose(np.asarray(out), np.asarray(ref_exact),
                               rtol=5e-2, atol=5e-2)

    print("KERNEL_OK")
</pallas_src>

<mosaic_0001>
module attributes {stable_mosaic.version = 11 : i64} {
  func.func @kernel(%arg0: i32, %arg1: i32, %arg2: i32, %arg3: memref<2x1x4x144xf32, #tpu.memory_space<vmem>>, %arg4: memref<2x4x4x144xbf16, #tpu.memory_space<vmem>>, %arg5: memref<2x1x4x144xf32, #tpu.memory_space<vmem>>) attributes {dimension_semantics = [#tpu.dimension_semantics<parallel>, #tpu.dimension_semantics<parallel>, #tpu.dimension_semantics<parallel>], iteration_bounds = array<i64: 1, 1, 2>, scalar_prefetch = 0 : i64, scratch_operands = 0 : i64, tpu.core_type = #tpu.core_type<tc>, window_params = [{transform_indices = @transform_0, window_bounds = array<i64: 2, 1, 4, 144>}, {transform_indices = @transform_1, window_bounds = array<i64: 2, 4, 4, 144>}, {transform_indices = @transform_2, window_bounds = array<i64: 2, 1, 4, 144>}]} {
    %c0 = arith.constant 0 : index
    %c0_0 = arith.constant 0 : index
    %c0_1 = arith.constant 0 : index
    %c0_2 = arith.constant 0 : index
    %0 = vector.load %arg3[%c0, %c0_0, %c0_1, %c0_2] : memref<2x1x4x144xf32, #tpu.memory_space<vmem>>, vector<1x1x4x144xf32>
    %1 = vector.shape_cast %0 : vector<1x1x4x144xf32> to vector<4x144xf32>
    %c1 = arith.constant 1 : index
    %c0_3 = arith.constant 0 : index
    %c0_4 = arith.constant 0 : index
    %c0_5 = arith.constant 0 : index
    %2 = vector.load %arg3[%c1, %c0_3, %c0_4, %c0_5] : memref<2x1x4x144xf32, #tpu.memory_space<vmem>>, vector<1x1x4x144xf32>
    %3 = vector.shape_cast %2 : vector<1x1x4x144xf32> to vector<4x144xf32>
    %c0_6 = arith.constant 0 : index
    %c0_7 = arith.constant 0 : index
    %c0_8 = arith.constant 0 : index
    %c0_9 = arith.constant 0 : index
    %4 = vector.load %arg4[%c0_6, %c0_7, %c0_8, %c0_9] : memref<2x4x4x144xbf16, #tpu.memory_space<vmem>>, vector<1x1x4x144xbf16>
    %5 = vector.shape_cast %4 : vector<1x1x4x144xbf16> to vector<4x144xbf16>
    %6 = arith.extf %5 : vector<4x144xbf16> to vector<4x144xf32>
    %c1_10 = arith.constant 1 : index
    %c0_11 = arith.constant 0 : index
    %c0_12 = arith.constant 0 : index
    %c0_13 = arith.constant 0 : index
    %7 = vector.load %arg4[%c1_10, %c0_11, %c0_12, %c0_13] : memref<2x4x4x144xbf16, #tpu.memory_space<vmem>>, vector<1x1x4x144xbf16>
    %8 = vector.shape_cast %7 : vector<1x1x4x144xbf16> to vector<4x144xbf16>
    %9 = arith.extf %8 : vector<4x144xbf16> to vector<4x144xf32>
    %10 = arith.mulf %1, %6 : vector<4x144xf32>
    %11 = arith.mulf %3, %9 : vector<4x144xf32>
    %12 = arith.subf %10, %11 : vector<4x144xf32>
    %13 = arith.mulf %1, %9 : vector<4x144xf32>
    %14 = arith.mulf %3, %6 : vector<4x144xf32>
    %15 = arith.addf %13, %14 : vector<4x144xf32>
    %cst = arith.constant dense<0.000000e+00> : vector<144xf32>
    %16 = vector.multi_reduction <add>, %12, %cst [0] : vector<4x144xf32> to vector<144xf32>
    %17 = vector.shape_cast %16 : vector<144xf32> to vector<1x144xf32>
    %cst_14 = arith.constant dense<0.000000e+00> : vector<144xf32>
    %18 = vector.multi_reduction <add>, %15, %cst_14 [0] : vector<4x144xf32> to vector<144xf32>
    %19 = vector.shape_cast %18 : vector<144xf32> to vector<1x144xf32>
    %c0_15 = arith.constant 0 : index
    %c1_16 = arith.constant 1 : index
    %c0_17 = arith.constant 0 : index
    %c0_18 = arith.constant 0 : index
    %20 = vector.load %arg4[%c0_15, %c1_16, %c0_17, %c0_18] : memref<2x4x4x144xbf16, #tpu.memory_space<vmem>>, vector<1x1x4x144xbf16>
    %21 = vector.shape_cast %20 : vector<1x1x4x144xbf16> to vector<4x144xbf16>
    %22 = arith.extf %21 : vector<4x144xbf16> to vector<4x144xf32>
    %c1_19 = arith.constant 1 : index
    %c1_20 = arith.constant 1 : index
    %c0_21 = arith.constant 0 : index
    %c0_22 = arith.constant 0 : index
    %23 = vector.load %arg4[%c1_19, %c1_20, %c0_21, %c0_22] : memref<2x4x4x144xbf16, #tpu.memory_space<vmem>>, vector<1x1x4x144xbf16>
    %24 = vector.shape_cast %23 : vector<1x1x4x144xbf16> to vector<4x144xbf16>
    %25 = arith.extf %24 : vector<4x144xbf16> to vector<4x144xf32>
    %26 = arith.mulf %1, %22 : vector<4x144xf32>
    %27 = arith.mulf %3, %25 : vector<4x144xf32>
    %28 = arith.subf %26, %27 : vector<4x144xf32>
    %29 = arith.mulf %1, %25 : vector<4x144xf32>
    %30 = arith.mulf %3, %22 : vector<4x144xf32>
    %31 = arith.addf %29, %30 : vector<4x144xf32>
    %cst_23 = arith.constant dense<0.000000e+00> : vector<144xf32>
    %32 = vector.multi_reduction <add>, %28, %cst_23 [0] : vector<4x144xf32> to vector<144xf32>
    %33 = vector.shape_cast %32 : vector<144xf32> to vector<1x144xf32>
    %cst_24 = arith.constant dense<0.000000e+00> : vector<144xf32>
    %34 = vector.multi_reduction <add>, %31, %cst_24 [0] : vector<4x144xf32> to vector<144xf32>
    %35 = vector.shape_cast %34 : vector<144xf32> to vector<1x144xf32>
    %c0_25 = arith.constant 0 : index
    %c2 = arith.constant 2 : index
    %c0_26 = arith.constant 0 : index
    %c0_27 = arith.constant 0 : index
    %36 = vector.load %arg4[%c0_25, %c2, %c0_26, %c0_27] : memref<2x4x4x144xbf16, #tpu.memory_space<vmem>>, vector<1x1x4x144xbf16>
    %37 = vector.shape_cast %36 : vector<1x1x4x144xbf16> to vector<4x144xbf16>
    %38 = arith.extf %37 : vector<4x144xbf16> to vector<4x144xf32>
    %c1_28 = arith.constant 1 : index
    %c2_29 = arith.constant 2 : index
    %c0_30 = arith.constant 0 : index
    %c0_31 = arith.constant 0 : index
    %39 = vector.load %arg4[%c1_28, %c2_29, %c0_30, %c0_31] : memref<2x4x4x144xbf16, #tpu.memory_space<vmem>>, vector<1x1x4x144xbf16>
    %40 = vector.shape_cast %39 : vector<1x1x4x144xbf16> to vector<4x144xbf16>
    %41 = arith.extf %40 : vector<4x144xbf16> to vector<4x144xf32>
    %42 = arith.mulf %1, %38 : vector<4x144xf32>
    %43 = arith.mulf %3, %41 : vector<4x144xf32>
    %44 = arith.subf %42, %43 : vector<4x144xf32>
    %45 = arith.mulf %1, %41 : vector<4x144xf32>
    %46 = arith.mulf %3, %38 : vector<4x144xf32>
    %47 = arith.addf %45, %46 : vector<4x144xf32>
    %cst_32 = arith.constant dense<0.000000e+00> : vector<144xf32>
    %48 = vector.multi_reduction <add>, %44, %cst_32 [0] : vector<4x144xf32> to vector<144xf32>
    %49 = vector.shape_cast %48 : vector<144xf32> to vector<1x144xf32>
    %cst_33 = arith.constant dense<0.000000e+00> : vector<144xf32>
    %50 = vector.multi_reduction <add>, %47, %cst_33 [0] : vector<4x144xf32> to vector<144xf32>
    %51 = vector.shape_cast %50 : vector<144xf32> to vector<1x144xf32>
    %c0_34 = arith.constant 0 : index
    %c3 = arith.constant 3 : index
    %c0_35 = arith.constant 0 : index
    %c0_36 = arith.constant 0 : index
    %52 = vector.load %arg4[%c0_34, %c3, %c0_35, %c0_36] : memref<2x4x4x144xbf16, #tpu.memory_space<vmem>>, vector<1x1x4x144xbf16>
    %53 = vector.shape_cast %52 : vector<1x1x4x144xbf16> to vector<4x144xbf16>
    %54 = arith.extf %53 : vector<4x144xbf16> to vector<4x144xf32>
    %c1_37 = arith.constant 1 : index
    %c3_38 = arith.constant 3 : index
    %c0_39 = arith.constant 0 : index
    %c0_40 = arith.constant 0 : index
    %55 = vector.load %arg4[%c1_37, %c3_38, %c0_39, %c0_40] : memref<2x4x4x144xbf16, #tpu.memory_space<vmem>>, vector<1x1x4x144xbf16>
    %56 = vector.shape_cast %55 : vector<1x1x4x144xbf16> to vector<4x144xbf16>
    %57 = arith.extf %56 : vector<4x144xbf16> to vector<4x144xf32>
    %58 = arith.mulf %1, %54 : vector<4x144xf32>
    %59 = arith.mulf %3, %57 : vector<4x144xf32>
    %60 = arith.subf %58, %59 : vector<4x144xf32>
    %61 = arith.mulf %1, %57 : vector<4x144xf32>
    %62 = arith.mulf %3, %54 : vector<4x144xf32>
    %63 = arith.addf %61, %62 : vector<4x144xf32>
    %cst_41 = arith.constant dense<0.000000e+00> : vector<144xf32>
    %64 = vector.multi_reduction <add>, %60, %cst_41 [0] : vector<4x144xf32> to vector<144xf32>
    %65 = vector.shape_cast %64 : vector<144xf32> to vector<1x144xf32>
    %cst_42 = arith.constant dense<0.000000e+00> : vector<144xf32>
    %66 = vector.multi_reduction <add>, %63, %cst_42 [0] : vector<4x144xf32> to vector<144xf32>
    %67 = vector.shape_cast %66 : vector<144xf32> to vector<1x144xf32>
    %68 = tpu.concatenate %17, %33, %49, %65 in 0 : vector<1x144xf32>, vector<1x144xf32>, vector<1x144xf32>, vector<1x144xf32> -> vector<4x144xf32>
    %c0_43 = arith.constant 0 : index
    %c0_44 = arith.constant 0 : index
    %c0_45 = arith.constant 0 : index
    %c0_46 = arith.constant 0 : index
    %69 = vector.load %arg5[%c0_43, %c0_44, %c0_45, %c0_46] : memref<2x1x4x144xf32, #tpu.memory_space<vmem>>, vector<1x1x4x144xf32>
    %70 = vector.shape_cast %69 : vector<1x1x4x144xf32> to vector<4x144xf32>
    %71 = vector.shape_cast %68 : vector<4x144xf32> to vector<1x1x4x144xf32>
    tpu.vector_store %arg5[%c0_43, %c0_44, %c0_45, %c0_46], %71 {strides = array<i32>} : memref<2x1x4x144xf32, #tpu.memory_space<vmem>>, vector<1x1x4x144xf32>,
    %72 = tpu.concatenate %19, %35, %51, %67 in 0 : vector<1x144xf32>, vector<1x144xf32>, vector<1x144xf32>, vector<1x144xf32> -> vector<4x144xf32>
    %c1_47 = arith.constant 1 : index
    %c0_48 = arith.constant 0 : index
    %c0_49 = arith.constant 0 : index
    %c0_50 = arith.constant 0 : index
    %73 = vector.load %arg5[%c1_47, %c0_48, %c0_49, %c0_50] : memref<2x1x4x144xf32, #tpu.memory_space<vmem>>, vector<1x1x4x144xf32>
    %74 = vector.shape_cast %73 : vector<1x1x4x144xf32> to vector<4x144xf32>
    %75 = vector.shape_cast %72 : vector<4x144xf32> to vector<1x1x4x144xf32>
    tpu.vector_store %arg5[%c1_47, %c0_48, %c0_49, %c0_50], %75 {strides = array<i32>} : memref<2x1x4x144xf32, #tpu.memory_space<vmem>>, vector<1x1x4x144xf32>,
    return
  }
  func.func @transform_0(%arg0: i32, %arg1: i32, %arg2: i32) -> (i32, i32, i32, i32) {
    %c0_i32 = arith.constant 0 : i32
    %c0_i32_0 = arith.constant 0 : i32
    %c0_i32_1 = arith.constant 0 : i32
    return %c0_i32, %arg2, %c0_i32_0, %arg1 : i32, i32, i32, i32
  }
  func.func @transform_1(%arg0: i32, %arg1: i32, %arg2: i32) -> (i32, i32, i32, i32) {
    %c0_i32 = arith.constant 0 : i32
    %c0_i32_0 = arith.constant 0 : i32
    %c0_i32_1 = arith.constant 0 : i32
    return %c0_i32, %arg0, %c0_i32_0, %arg1 : i32, i32, i32, i32
  }
  func.func @transform_2(%arg0: i32, %arg1: i32, %arg2: i32) -> (i32, i32, i32, i32) {
    %c0_i32 = arith.constant 0 : i32
    %c0_i32_0 = arith.constant 0 : i32
    return %c0_i32, %arg2, %arg0, %arg1 : i32, i32, i32, i32
  }
}

</mosaic_0001>

<bundles_post_ra>
// kernel: tpu_custom_call.1
= control target key start
LH: loop header
LB: loop body
LE: loop exit
PB: predicated region body
PF: predicated region fallthrough
CT: control target
= control target key end

     0   :  { %7 = vsyncpa [#allocation3], 0  ;;  %s1084_s0 = inlined_call_operand.hbm [shape: f32[2,2,4,144], index: 0, kind: input, shape index: {}]   ;;  %s1085_s1 = inlined_call_operand.hbm [shape: bf16[2,4,4,144], index: 1, kind: input, shape index: {}]   ;;  %s1086_s2 = inlined_call_operand.hbm [shape: f32[2,2,4,144], index: 2, kind: output, shape index: {}]  }
   0x1   :  { %9 = vsyncpa [#allocation3 + $0x1], 0 }
   0x2   :  { %10 = vsyncpa [#allocation6], 0 }
   0x3   :  { %11 = vsyncpa [#allocation4], 0 }
   0x4   :  { %13 = vsyncpa [#allocation4 + $0x1], 0  ;;  %s868_s9 = smov 0   ;;  %s870_s10 = smov 0  }
   0x5   :  { %s872_s11 = smov 0   ;;  %s874_s12 = smov 0  }
   0x6   :  { %s876_s13 = smov 0   ;;  %s878_s14 = smov 0  }
   0x7 LB: > { %s594_s15 = sadd.s32 4294967295, %s842_s14   ;;  %s595_s16 = sadd.s32 4294967294, %s842_s14   ;;  %s842_s14 = sphi %s878_s14, %s19_s14   ;;  %s838_s13 = sphi %s876_s13, %s1100_s13   ;;  %s834_s12 = sphi %s874_s12, %s1099_s12   ;;  %s830_s11 = sphi %s872_s11, %s1098_s11   ;;  %s826_s10 = sphi %s870_s10, %s1097_s10   ;;  %s822_s9 = sphi %s868_s9, %s1096_s9  }
   0x8   : > { %p60_p0 = scmp.ne.s32.totalorder %s826_s10, %s822_s9  ;;  %p902_p1 = scmp.eq.s32.totalorder %s594_s15, 0 }
   0x9   : > { %p906_p2 = scmp.eq.s32.totalorder %s594_s15, 1  ;;  %p122_p3 = scmp.eq.s32.totalorder %s595_s16, 1 }
   0xa   : > { %p912_p4 = por %p902_p1, %p60_p0  ;;  %p596_p5 = scmp.ge.s32.totalorder %s842_s14, 1 }
   0xb   : > { %p917_p6 = por %p122_p3, %p60_p0  ;;  %p129_p7 = scmp.lt.s32.totalorder %s842_s14, 3 }
   0xc   : > { %s146_s23 = sshll.u32 %s1085_s1, 4  ;;  %s844_s25 = smov [#allocation5]   ;;  %s147_s23 = int_to_ptr.hbm [resolvable:$true] %s146_s23 }
   0xd   : > { %p925_p8 = pnand %p596_p5, %p129_p7  ;;  %s148_s26 = sshll.u32 %s844_s25, 4  ;;  %s149_s26 = int_to_ptr.vmem [resolvable:$true] %s148_s26 }
   0xe   : > { %p598_p11 = scmp.ge.s32.totalorder %s842_s14, 2  ;;  %s845_s27 = smov 64  }
   0xf   : > { %p623_p9 = pneg %p925_p8  ;;  %s846_s28 = smov 4  }
  0x10   : > { %s31_s29 = sadd.s32 1, %s838_s13  ;;  %s47_s30 = sadd.s32 1, %s830_s11 }
  0x11   : > { %p624_p10 = pnand %p623_p9, %p902_p1  ;;  %p32_p12 = scmp.ge.s32.totalorder %s31_s29, 2 }
  0x12   : > { %p54_p13 = scmp.ne.s32.totalorder %s830_s11, %s826_s10  ;;  %p55_p0 = scmp.eq.s32.totalorder %s842_s14, 0 }
  0x13   : > { %626 = dma.hbm_to_vmem [thread:$0]  (!%p624_p10), %s147_s23, 512, %s149_s26, [#allocation6], %s845_s27, %s845_s27, %s846_s28  }
  0x14   : > { %s1102_s29 = smov (%p32_p12, %s31_s29), 0  ;;  %p941_p3 = por %p55_p0, %p54_p13 }
  0x15   : > { %p947_p5 = por %p906_p2, %p54_p13  ;;  %s42_s5 = ssub.s32 %s838_s13, %s1102_s29 }
  0x16   : > { %p636_p7 = scmp.lt.s32.totalorder %s842_s14, 2  ;;  %p45_p9 = scmp.eq.s32.totalorder %s42_s5, 0 }
  0x17   : > { %s162_s6 = sand.u32 1, %s830_s11   ;;  %s613_s15 = sshll.u32 %s838_s13, 3 }
  0x18   : > { %s599_s7 = sshll.u32 %s162_s6, 4  ;;  %s173_s22 = scalar_lea.hbm %s1084_s0, %s613_s15 }
  0x19   : > { %s956_s8 = scalar_select %p45_p9, %s830_s11, %s47_s30  }
  0x1a   : > { %s166_s23 = scalar_lea.vmem [#allocation2], %s599_s7  ;;  %s174_s18 = sshll.u32 %s173_s22, 4  ;;  %s175_s18 = int_to_ptr.hbm [resolvable:$true] %s174_s18 }
  0x1b   : > { %s176_s25 = sshll.u32 %s166_s23, 4  ;;  %p628_p2 = pnand %p636_p7, %p941_p3  ;;  %s177_s25 = int_to_ptr.vmem [resolvable:$true] %s176_s25 }
  0x1c   : > { %s163_s26 = scalar_lea.sflag [#allocation3], %s162_s6  ;;  %s847_s27 = smov 256  }
  0x1d   : > { %s848_s28 = smov 128   ;;  %s849_s5 = smov 8  }
  0x1e   : > { %630 = dma.hbm_to_vmem [thread:$0]  (!%p628_p2), %s175_s18, 256, %s177_s25, %s163_s26, %s847_s27, %s848_s28, %s849_s5  }
  0x1f   : > { %188 = sbr.rel (%p925_p8) target bundleno = 133 (0x85), region = 28  ;;  %s967_s30 = sand.u32 (!%p925_p8), 1, %s826_s10  }
  0x20   : > { %s603_s7 = sshll.u32 (!%p925_p8), %s967_s30, 4  ;;  %s191_s15 = scalar_lea.sflag (!%p925_p8), [#allocation3], %s967_s30 }
  0x21   : > { %s194_s3 = scalar_lea.vmem (!%p925_p8), [#allocation2], %s603_s7 }
  0x24   : > { %809 = dma.done.wait (%p912_p4), %s191_s15, 256  }
  0x25   : > { %811 = vsyncadd (%p912_p4), %s191_s15, 4294967040 }
  0x26   : > { %813 = dma.done.wait (%p902_p1), [#allocation6], 512  }
  0x27   : > { %815 = vsyncadd (%p902_p1), [#allocation6], 4294966784  ;;  %v981_v0 = vld [vmem:[%s194_s3] sm:$0xff]  ;;  %v983_v2 = vld [vmem:[%s194_s3 + $0x8] sm:$0xff]  ;;  %vm245_vm0 = vcmask 1043456   ;;  %vm253_vm1 = vcmask 125952  }
  0x28   : > { %v228_v1 = vld [vmem:[#allocation5] sm:$0xff]   ;;  %v231_v4 = vld [vmem:[#allocation5 + $0x10] sm:$0xff]   ;;  %v334_v23 = vld [vmem:[#allocation5 + $0x8] sm:$0xff]   ;;  %vm437_vm2 = vcmask 1040384   ;;  %vm440_vm3 = vcmask 1041408   ;;  %vm443_vm4 = vcmask 1042432  }
  0x29   : > { %v229_v3 = vunpack.c.l.bf16 %v228_v1  ;;  %v232_v5 = vunpack.c.l.bf16 %v231_v4  ;;  %v283_v12 = vunpack.c.h.bf16 %v228_v1  ;;  %v286_v13 = vunpack.c.h.bf16 %v231_v4  ;;  %v337_v24 = vld [vmem:[#allocation5 + $0x18] sm:$0xff]   ;;  %s614_s17 = sshll.u32 %s834_s12, 3  ;;  %s220_s6 = scalar_lea.vmem [#allocation7], %s603_s7 }
  0x2a   : > { %v335_v25 = vunpack.c.l.bf16 %v334_v23  ;;  %v338_v26 = vunpack.c.l.bf16 %v337_v24  ;;  %v387_v42 = vunpack.c.h.bf16 %v334_v23  ;;  %v390_v43 = vunpack.c.h.bf16 %v337_v24  ;;  %s483_s24 = scalar_lea.hbm %s1086_s2, %s614_s17  ;;  %s484_s16 = sshll.u32 %s220_s6, 4  ;;  %s1040_s16 = int_to_ptr.vmem [resolvable:$true] %s484_s16 }
  0x2b   : > { %v233_v6 = vmul.f32 %v229_v3, %v981_v0  ;;  %v234_v7 = vmul.f32 %v983_v2, %v232_v5  ;;  %v236_v9 = vmul.f32 %v232_v5, %v981_v0  ;;  %v237_v10 = vmul.f32 %v983_v2, %v229_v3  ;;  %s486_s21 = sshll.u32 %s483_s24, 4  ;;  %s468_s22 = scalar_lea.sflag [#allocation4], %s967_s30  ;;  %s487_s21 = int_to_ptr.hbm [resolvable:$true] %s486_s21 }
  0x2c   : > { %v287_v16 = vmul.f32 %v283_v12, %v981_v0  ;;  %v288_v17 = vmul.f32 %v983_v2, %v286_v13  ;;  %v290_v21 = vmul.f32 %v286_v13, %v981_v0  ;;  %v291_v22 = vmul.f32 %v983_v2, %v283_v12  ;;  %s770_s23 = sshra.s32 %s487_s21, 4  ;;  %s776_s27 = scalar_lea.hbm %s1086_s2, 32  ;;  %s771_s23 = int_to_ptr.hbm [resolvable:$true] %s770_s23 }
  0x2d   : > { %v235_v8 = vsub.f32 %v233_v6, %v234_v7  ;;  %v238_v11 = vadd.f32 %v237_v10, %v236_v9  ;;  %v339_v30 = vmul.f32 %v335_v25, %v981_v0  ;;  %v340_v31 = vmul.f32 %v983_v2, %v338_v26  ;;  %s772_s25 = scalar_lea.hbm %s771_s23, 16  ;;  %p777_p10 = scmp.lt.s32.totalorder %s771_s23, %s1086_s2 }
  0x2e   : > { %v289_v18 = vsub.f32 %v287_v16, %v288_v17  ;;  %v292_v27 = vadd.f32 %v291_v22, %v290_v21  ;;  %v342_v35 = vmul.f32 %v338_v26, %v981_v0  ;;  %v343_v36 = vmul.f32 %v983_v2, %v335_v25  ;;  %p773_p1 = scmp.ne.s32.totalorder %s771_s23, %s772_s25  ;;  %p778_p12 = scmp.lt.s32.totalorder %s776_s27, %s772_s25 }
  0x2f   : > { %240 = vst [vmem:[#allocation1] ss:$2 sm:$0xff] %v235_v8  ;;  %v341_v32 = vsub.f32 %v339_v30, %v340_v31  ;;  %v391_v50 = vmul.f32 %v387_v42, %v981_v0  ;;  %v392_v51 = vmul.f32 %v983_v2, %v390_v43  ;;  %v394_v6 = vmul.f32 %v390_v43, %v981_v0 }
  0x30   : > { %v344_v41 = vadd.f32 %v343_v36, %v342_v35  ;;  %v395_v10 = vmul.f32 %v983_v2, %v387_v42  ;;  %vm451_vm5 = vcmask 130052   ;;  %p774_p4 = pnand %p773_p1, %p947_p5  ;;  %p779_p13 = por %p778_p12, %p777_p10 }
  0x31   : > { %v393_v59 = vsub.f32 %v391_v50, %v392_v51  ;;  %vm1025_vm6 = vmor %vm451_vm5, %vm245_vm0 }
  0x32   : > { %v396_v23 = vadd.f32 %v395_v10, %v394_v6  ;;  %p775_p8 = pneg %p774_p4 }
  0x34   : > { %p780_p0 = pnand %p779_p13, %p775_p8 }
  0x36   : > { %v241_v14 = vld.sshfl [vmem:[#allocation1] sm:$0xff pattern:$0x75316420]  ;;  %v242_v15 = vld.sshfl [vmem:[#allocation1 + $0x8] sm:$0xff pattern:$0x75316420] }
  0x37   : > { %262 = vst [vmem:[#allocation1] ss:$2 sm:$0xff] %v238_v11  ;;  %v246_v37 = vsel %vm245_vm0, %v241_v14, 0.0  ;;  %v254_v38 = vsel %vm253_vm1, %v242_v15, 0.0 }
  0x38   : > { %v247_v39 = vrot.slane %v246_v37, 4  ;;  %v255_v44 = vrot.slane %v254_v38, 4 }
  0x3a   : > { %v248_v49 = vadd.f32 %v247_v39, %v246_v37  ;;  %v256_v52 = vadd.f32 %v255_v44, %v254_v38 }
  0x3c   : > { %v249_v57 = vrot.slane %v248_v49, 2  ;;  %v257_v60 = vrot.slane %v256_v52, 2 }
  0x3e   : > { %v263_v19 = vld.sshfl [vmem:[#allocation1] sm:$0xff pattern:$0x75316420]  ;;  %v264_v20 = vld.sshfl [vmem:[#allocation1 + $0x8] sm:$0xff pattern:$0x75316420]  ;;  %v250_v9 = vadd.f32 %v249_v57, %v248_v49  ;;  %v258_v11 = vadd.f32 %v257_v60, %v256_v52 }
  0x3f   : > { %294 = vst [vmem:[#allocation1] ss:$2 sm:$0xff] %v289_v18  ;;  %v267_v56 = vsel %vm245_vm0, %v263_v19, 0.0  ;;  %v274_v4 = vsel %vm253_vm1, %v264_v20, 0.0 }
  0x40   : > { %v268_v63 = vrot.slane %v267_v56, 4  ;;  %v275_v16 = vrot.slane %v274_v4, 4  ;;  %v251_v21 = vrot.slane %v250_v9, 1  ;;  %v259_v25 = vrot.slane %v258_v11, 1 }
  0x42   : > { %v269_v15 = vadd.f32 %v268_v63, %v267_v56  ;;  %v252_v35 = vadd.f32 %v251_v21, %v250_v9 }
  0x46   : > { %v295_v28 = vld.sshfl [vmem:[#allocation1] sm:$0xff pattern:$0x75316420]  ;;  %v296_v29 = vld.sshfl [vmem:[#allocation1 + $0x8] sm:$0xff pattern:$0x75316420] }
  0x47   : > { %314 = vst [vmem:[#allocation1] ss:$2 sm:$0xff] %v292_v27  ;;  %v306_v40 = vsel %vm253_vm1, %v296_v29, 0.0  ;;  %v299_v45 = vsel %vm245_vm0, %v295_v28, 0.0  ;;  %v270_v27 = vrot.slane %v269_v15, 2  ;;  %v276_v28 = vadd.f32 %v275_v16, %v274_v4 }
  0x48   : > { %v307_v46 = vrot.slane %v306_v40, 4  ;;  %v300_v53 = vrot.slane %v299_v45, 4 }
  0x49   : > { %v277_v44 = vrot.slane %v276_v28, 2 }
  0x4a   : > { %v308_v55 = vadd.f32 %v307_v46, %v306_v40  ;;  %v301_v62 = vadd.f32 %v300_v53, %v299_v45  ;;  %v260_v45 = vadd.f32 %v259_v25, %v258_v11 }
  0x4c   : > { %v309_v1 = vrot.slane %v308_v55, 2  ;;  %v302_v14 = vrot.slane %v301_v62, 2 }
  0x4e   : > { %v315_v33 = vld.sshfl [vmem:[#allocation1] sm:$0xff pattern:$0x75316420]  ;;  %v316_v34 = vld.sshfl [vmem:[#allocation1 + $0x8] sm:$0xff pattern:$0x75316420]  ;;  %v310_v18 = vadd.f32 %v309_v1, %v308_v55  ;;  %v303_v26 = vadd.f32 %v302_v14, %v301_v62 }
  0x4f   : > { %346 = vst [vmem:[#allocation1] ss:$2 sm:$0xff] %v341_v32  ;;  %v326_v5 = vsel %vm253_vm1, %v316_v34, 0.0  ;;  %v319_v13 = vsel %vm245_vm0, %v315_v33, 0.0 }
  0x50   : > { %v327_v20 = vrot.slane %v326_v5, 4  ;;  %v320_v0 = vrot.slane %v319_v13, 4  ;;  %v311_v29 = vrot.slane %v310_v18, 1 }
  0x52   : > { %v328_v31 = vadd.f32 %v327_v20, %v326_v5  ;;  %v321_v36 = vadd.f32 %v320_v0, %v319_v13  ;;  %v312_v49 = vadd.f32 %v311_v29, %v310_v18 }
  0x54   : > { %v322_v52 = vrot.slane %v321_v36, 2 }
  0x56   : > { %v347_v47 = vld.sshfl [vmem:[#allocation1] sm:$0xff pattern:$0x75316420]  ;;  %v348_v48 = vld.sshfl [vmem:[#allocation1 + $0x8] sm:$0xff pattern:$0x75316420]  ;;  %v323_v4 = vadd.f32 %v322_v52, %v321_v36 }
  0x57   : > { %366 = vst [vmem:[#allocation1] ss:$2 sm:$0xff] %v344_v41  ;;  %v358_v54 = vsel %vm253_vm1, %v348_v48, 0.0  ;;  %v351_v58 = vsel %vm245_vm0, %v347_v47, 0.0  ;;  %v304_v41 = vrot.slane %v303_v26, 1  ;;  %v329_v47 = vrot.slane %v328_v31, 2 }
  0x58   : > { %v359_v61 = vrot.slane %v358_v54, 4  ;;  %v352_v3 = vrot.slane %v351_v58, 4  ;;  %v324_v25 = vrot.slane %v323_v4, 1 }
  0x59   : > { %v305_v56 = vadd.f32 %v304_v41, %v303_v26 }
  0x5a   : > { %v360_v12 = vadd.f32 %v359_v61, %v358_v54  ;;  %v353_v19 = vadd.f32 %v352_v3, %v351_v58  ;;  %v271_v54 = vadd.f32 %v270_v27, %v269_v15  ;;  %v330_v61 = vadd.f32 %v329_v47, %v328_v31 }
  0x5b   : > { %v439_v3 = vsel %vm437_vm2, %v260_v45, %v312_v49  ;;  %v438_v0 = vsel %vm437_vm2, %v252_v35, %v305_v56 }
  0x5c   : > { %v361_v24 = vrot.slane %v360_v12, 2  ;;  %v354_v30 = vrot.slane %v353_v19, 2  ;;  %v331_v16 = vrot.slane %v330_v61, 1  ;;  %v272_v31 = vrot.slane %v271_v54, 1 }
  0x5e   : > { %v367_v7 = vld.sshfl [vmem:[#allocation1] sm:$0xff pattern:$0x75316420]  ;;  %v368_v8 = vld.sshfl [vmem:[#allocation1 + $0x8] sm:$0xff pattern:$0x75316420]  ;;  %v362_v37 = vadd.f32 %v361_v24, %v360_v12  ;;  %v355_v46 = vadd.f32 %v354_v30, %v353_v19 }
  0x5f   : > { %398 = vst [vmem:[#allocation1] ss:$2 sm:$0xff] %v393_v59  ;;  %v378_v17 = vsel %vm253_vm1, %v368_v8, 0.0  ;;  %v371_v22 = vsel %vm245_vm0, %v367_v7, 0.0  ;;  %v278_v59 = vadd.f32 %v277_v44, %v276_v28  ;;  %v273_v44 = vadd.f32 %v272_v31, %v271_v54 }
  0x60   : > { %v379_v2 = vrot.slane %v378_v17, 4  ;;  %v372_v32 = vrot.slane %v371_v22, 4  ;;  %v363_v53 = vrot.slane %v362_v37, 1  ;;  %v356_v60 = vrot.slane %v355_v46, 1 }
  0x62   : > { %v380_v40 = vadd.f32 %v379_v2, %v378_v17  ;;  %v373_v48 = vadd.f32 %v372_v32, %v371_v22  ;;  %v364_v7 = vadd.f32 %v363_v53, %v362_v37  ;;  %v357_v15 = vadd.f32 %v356_v60, %v355_v46 }
  0x64   : > { %v381_v55 = vrot.slane %v380_v40, 2  ;;  %v374_v62 = vrot.slane %v373_v48, 2  ;;  %v442_v22 = vsel %vm440_vm3, %v439_v3, %v364_v7  ;;  %v441_v28 = vsel %vm440_vm3, %v438_v0, %v357_v15 }
  0x66   : > { %v399_v33 = vld.sshfl [vmem:[#allocation1] sm:$0xff pattern:$0x75316420]  ;;  %v400_v34 = vld.sshfl [vmem:[#allocation1 + $0x8] sm:$0xff pattern:$0x75316420]  ;;  %v382_v8 = vadd.f32 %v381_v55, %v380_v40  ;;  %v375_v17 = vadd.f32 %v374_v62, %v373_v48  ;;  %v325_v40 = vadd.f32 %v324_v25, %v323_v4 }
  0x67   : > { %418 = vst [vmem:[#allocation1] ss:$2 sm:$0xff] %v396_v23  ;;  %v403_v38 = vsel %vm245_vm0, %v399_v33, 0.0  ;;  %v410_v39 = vsel %vm253_vm1, %v400_v34, 0.0  ;;  %v279_v23 = vrot.slane %v278_v59, 1  ;;  %v332_v34 = vadd.f32 %v331_v16, %v330_v61 }
  0x68   : > { %v404_v42 = vrot.slane %v403_v38, 4  ;;  %v411_v43 = vrot.slane %v410_v39, 4  ;;  %v383_v24 = vrot.slane %v382_v8, 1  ;;  %v376_v32 = vrot.slane %v375_v17, 1 }
  0x69   : > { %v454_v49 = vsel %vm437_vm2, %v273_v44, %v325_v40 }
  0x6a   : > { %v405_v50 = vadd.f32 %v404_v42, %v403_v38  ;;  %v412_v51 = vadd.f32 %v411_v43, %v410_v39  ;;  %v384_v38 = vadd.f32 %v383_v24, %v382_v8  ;;  %v280_v39 = vadd.f32 %v279_v23, %v278_v59 }
  0x6b   : > { %v377_v43 = vadd.f32 %v376_v32, %v375_v17 }
  0x6c   : > { %v406_v57 = vrot.slane %v405_v50, 2  ;;  %v413_v58 = vrot.slane %v412_v51, 2  ;;  %v455_v47 = vsel %vm437_vm2, %v280_v39, %v332_v34 }
  0x6d   : > { %v457_v48 = vsel %vm440_vm3, %v455_v47, %v384_v38 }
  0x6e   : > { %v407_v63 = vadd.f32 %v406_v57, %v405_v50  ;;  %v414_v1 = vadd.f32 %v413_v58, %v412_v51  ;;  %v419_v5 = vld.sshfl [vmem:[#allocation1] sm:$0xff pattern:$0x75316420]  ;;  %v420_v6 = vld.sshfl [vmem:[#allocation1 + $0x8] sm:$0xff pattern:$0x75316420]  ;;  %v456_v51 = vsel %vm440_vm3, %v454_v49, %v377_v43 }
  0x6f   : > { %v423_v9 = vsel %vm245_vm0, %v419_v5, 0.0  ;;  %v430_v10 = vsel %vm253_vm1, %v420_v6, 0.0 }
  0x70   : > { %v408_v11 = vrot.slane %v407_v63, 1  ;;  %v415_v12 = vrot.slane %v414_v1, 1  ;;  %v424_v13 = vrot.slane %v423_v9, 4  ;;  %v431_v14 = vrot.slane %v430_v10, 4 }
  0x72   : > { %v409_v18 = vadd.f32 %v408_v11, %v407_v63  ;;  %v416_v19 = vadd.f32 %v415_v12, %v414_v1  ;;  %v425_v20 = vadd.f32 %v424_v13, %v423_v9  ;;  %v432_v21 = vadd.f32 %v431_v14, %v430_v10 }
  0x74   : > { %v445_v2 = vsel %vm443_vm4, %v442_v22, %v416_v19  ;;  %v426_v26 = vrot.slane %v425_v20, 2  ;;  %v433_v27 = vrot.slane %v432_v21, 2  ;;  %v444_v33 = vsel %vm443_vm4, %v441_v28, %v409_v18 }
  0x75   : > { %v448_v29 = vrot.slane %v445_v2, 4 }
  0x76   : > { %v427_v35 = vadd.f32 %v426_v26, %v425_v20  ;;  %v434_v36 = vadd.f32 %v433_v27, %v432_v21 }
  0x77   : > { %v449_v37 = vsel %vm245_vm0, %v444_v33, %v448_v29 }
  0x78   : > { %453 = vst.msk [vmem:[%s220_s6] sm:$0xff] %vm1025_vm6, %v449_v37  ;;  %v428_v41 = vrot.slane %v427_v35, 1  ;;  %v435_v42 = vrot.slane %v434_v36, 1 }
  0x7a   : > { %v429_v45 = vadd.f32 %v428_v41, %v427_v35  ;;  %v436_v46 = vadd.f32 %v435_v42, %v434_v36 }
  0x7c   : > { %v459_v50 = vsel %vm443_vm4, %v457_v48, %v436_v46  ;;  %v458_v53 = vsel %vm443_vm4, %v456_v51, %v429_v45 }
  0x7d   : > { %v462_v52 = vrot.slane %v459_v50, 4 }
  0x7f   : > { %v463_v54 = vsel %vm245_vm0, %v458_v53, %v462_v52 }
  0x80   : > { %607 = vst.msk [vmem:[%s220_s6 + $0x8] sm:$0xff] %vm1025_vm6, %v463_v54 }
  0x81   : > { %783 = shalt.err (!%p780_p0)
}
  0x82   : > { %s850_s30 = smov 128   ;;  %s851_s7 = smov 256  }
  0x83   : > { %s852_s15 = smov 8  }
  0x84   : > { %621 = dma.vmem_to_hbm [thread:$0]  (%p947_p5), %s1040_s16, 256, %s487_s21, %s468_s22, %s850_s30, %s851_s7, %s852_s15  }
  0x85 PF: > { %s501_s3 = sand.u32 1, %s822_s9   ;;  %p632_p3 = pnand %p598_p11, %p917_p6 }
  0x86   : > { %s502_s17 = scalar_lea.sflag [#allocation4], %s501_s3 }
  0x87   : > { %p633_p7 = pneg %p632_p3 }
  0x89   : > { %817 = dma.done.wait (%p633_p7), %s502_s17, 256  }
  0x8a   : > { %819 = vsyncadd (%p633_p7), %s502_s17, 4294967040  ;;  %s19_s14 = sadd.s32 1, %s842_s14   ;;  %s1096_s9 = smov %s826_s10 }
  0x8b   : > { %p16_p9 = scmp.ge.s32.totalorder %s19_s14, 4   ;;  %s1097_s10 = smov %s830_s11 }
  0x8c   : > { %s1098_s11 = smov %s956_s8  ;;  %s1099_s12 = smov %s838_s13 }
  0x8d   : > { %s1100_s13 = smov %s1102_s29  ;;  %18 = sbr.rel (!%p16_p9) target bundleno = 7 (0x7), region = 87 }
  0x92   :  { %508 = vsyncpa [#allocation3], 1 }
  0x93   :  { %510 = vsyncpa [#allocation3 + $0x1], 1 }
  0x94   :  { %511 = vsyncpa [#allocation6], 1 }
  0x95   :  { %512 = vsyncpa [#allocation4], 1 }
  0x96   :  { %514 = vsyncpa [#allocation4 + $0x1], 1 }

</bundles_post_ra>
